<compile_context>
chip_gen: v7x
topology: tpu7x:2x2x1
jax: 0.10.0
libtpu: 0.0.40
codegen_flags: <defaults>
</compile_context>

<pallas_src>
import functools
import math

import jax
import jax.numpy as jnp
from jax import lax
from jax.experimental import pallas as pl
from jax.experimental.pallas import tpu as pltpu


def _sinpos_kernel(t_ref, out_ref, *, half_dim, scale):
    # t_ref:   (TB, 1)  float32 time values
    # out_ref: (TB, Dp) lane-padded embedding dim (Dp a multiple of 128)
    dp = out_ref.shape[-1]
    lane = lax.broadcasted_iota(jnp.int32, (1, dp), 1)
    is_sin = lane < half_dim
    # Frequency index: lanes [0, hd) and [hd, 2*hd) both map to 0..hd-1.
    k = jnp.where(is_sin, lane, lane - half_dim).astype(jnp.float32)
    freq = jnp.exp(k * jnp.float32(-scale))                       # (1, Dp)
    # sin(x) = cos(x - pi/2): one EUP transcendental instead of sin+cos+select.
    phase = jnp.where(is_sin, jnp.float32(-0.5 * math.pi), jnp.float32(0.0))
    arg = t_ref[...] * freq + phase                               # (TB, Dp)
    out_ref[...] = jnp.cos(arg).astype(out_ref.dtype)


_ROW_TILE = 512          # rows per grid step when B is large enough to tile
_GRID_THRESHOLD = 4096   # below this, a grid is pure per-step overhead


@functools.partial(jax.jit, static_argnames=("dim", "out_dtype"))
def sinusoidal_position_embeddings(time, dim, out_dtype=jnp.float32):
    """Pallas equivalent of SinusoidalPositionEmbeddings(dim)(time)."""
    assert dim % 2 == 0, "SinusoidalPositionEmbeddings requires an even dim"
    half_dim = dim // 2
    # NB: the reference module really uses `half_dim - 1 + 0.05`.
    scale = math.log(10000.0) / (half_dim - 1 + 0.05)

    b = time.shape[0]
    dim_pad = max(128, ((dim + 127) // 128) * 128)   # lane-dense output slab
    kernel = functools.partial(_sinpos_kernel, half_dim=half_dim, scale=scale)
    t2d = time.astype(jnp.float32)[:, None]          # keep (B,1); broadcast in-kernel

    if b >= _GRID_THRESHOLD:
        # Large batch: 1-D parallel grid over rows (shards across TCs on v7x).
        b_pad = ((b + _ROW_TILE - 1) // _ROW_TILE) * _ROW_TILE
        if b_pad != b:
            t2d = jnp.pad(t2d, ((0, b_pad - b), (0, 0)))
        out = pl.pallas_call(
            kernel,
            out_shape=jax.ShapeDtypeStruct((b_pad, dim_pad), out_dtype),
            grid=(b_pad // _ROW_TILE,),
            in_specs=[pl.BlockSpec((_ROW_TILE, 1), lambda i: (i, 0))],
            out_specs=pl.BlockSpec((_ROW_TILE, dim_pad), lambda i: (i, 0)),
            compiler_params=pltpu.CompilerParams(
                dimension_semantics=("parallel",)),
        )(t2d)
        if b_pad != b:
            out = out[:b]
    else:
        # Small/medium batch: grid-less single program (KiB-scale footprint).
        out = pl.pallas_call(
            kernel,
            out_shape=jax.ShapeDtypeStruct((b, dim_pad), out_dtype),
            in_specs=[pl.BlockSpec(memory_space=pltpu.MemorySpace.VMEM)],
            out_specs=pl.BlockSpec(memory_space=pltpu.MemorySpace.VMEM),
        )(t2d)

    if dim_pad != dim:
        out = out[:, :dim]   # fused into the jit; skipped when dim % 128 == 0
    return out


def reference_forward(time, dim):
    """Pure-JAX replica of the PyTorch forward."""
    half_dim = dim // 2
    scale = math.log(10000.0) / (half_dim - 1 + 0.05)
    emb = jnp.exp(jnp.arange(half_dim, dtype=jnp.float32) * -scale)
    emb = time.astype(jnp.float32)[:, None] * emb[None, :]
    return jnp.concatenate([jnp.sin(emb), jnp.cos(emb)], axis=-1)


if __name__ == "__main__":
    key = jax.random.PRNGKey(0)

    # Small shapes consistent with the module's use as a diffusion time embed.
    B, dim = 2, 32
    time = jax.random.uniform(key, (B,), jnp.float32, minval=0.0, maxval=1000.0)

    out = jax.block_until_ready(sinusoidal_position_embeddings(time, dim))
    ref = reference_forward(time, dim)
    assert out.shape == (B, dim), out.shape
    assert jnp.allclose(out, ref, atol=1e-3, rtol=1e-3), \
        float(jnp.max(jnp.abs(out - ref)))

    # Also exercise the no-crop (dim % 128 == 0) path.
    B2, dim2 = 16, 128
    time2 = jax.random.uniform(jax.random.PRNGKey(1), (B2,), jnp.float32,
                               minval=0.0, maxval=1000.0)
    out2 = jax.block_until_ready(sinusoidal_position_embeddings(time2, dim2))
    ref2 = reference_forward(time2, dim2)
    assert out2.shape == (B2, dim2), out2.shape
    assert jnp.allclose(out2, ref2, atol=1e-3, rtol=1e-3), \
        float(jnp.max(jnp.abs(out2 - ref2)))

    print("KERNEL_OK")
</pallas_src>

<mosaic_0001>
module attributes {stable_mosaic.version = 11 : i64} {
  func.func @_sinpos_kernel(%arg0: memref<2x1xf32, #tpu.memory_space<vmem>>, %arg1: memref<2x128xf32, #tpu.memory_space<vmem>>) attributes {dimension_semantics = [], scalar_prefetch = 0 : i64, scratch_operands = 0 : i64, tpu.core_type = #tpu.core_type<tc>} {
    %0 = tpu.iota {dimensions = array<i32: 1>} : vector<1x128xi32>
    %c16_i32 = arith.constant 16 : i32
    %1 = vector.broadcast %c16_i32 : i32 to vector<1x128xi32>
    %2 = arith.cmpi slt, %0, %1 : vector<1x128xi32>
    %c16_i32_0 = arith.constant 16 : i32
    %3 = vector.broadcast %c16_i32_0 : i32 to vector<1x128xi32>
    %4 = arith.subi %0, %3 : vector<1x128xi32>
    %5 = arith.select %2, %0, %4 : vector<1x128xi1>, vector<1x128xi32>
    %6 = arith.sitofp %5 : vector<1x128xi32> to vector<1x128xf32>
    %cst = arith.constant -0.611982762 : f32
    %7 = vector.broadcast %cst : f32 to vector<1x128xf32>
    %8 = arith.mulf %6, %7 : vector<1x128xf32>
    %9 = math.exp %8 : vector<1x128xf32>
    %cst_1 = arith.constant -1.57079637 : f32
    %cst_2 = arith.constant 0.000000e+00 : f32
    %10 = vector.broadcast %cst_1 : f32 to vector<1x128xf32>
    %11 = vector.broadcast %cst_2 : f32 to vector<1x128xf32>
    %12 = arith.select %2, %10, %11 : vector<1x128xi1>, vector<1x128xf32>
    %c0 = arith.constant 0 : index
    %c0_3 = arith.constant 0 : index
    %13 = vector.load %arg0[%c0, %c0_3] : memref<2x1xf32, #tpu.memory_space<vmem>>, vector<2x1xf32>
    %14 = vector.broadcast %13 : vector<2x1xf32> to vector<2x128xf32>
    %15 = vector.broadcast %9 : vector<1x128xf32> to vector<2x128xf32>
    %16 = arith.mulf %14, %15 : vector<2x128xf32>
    %17 = vector.broadcast %12 : vector<1x128xf32> to vector<2x128xf32>
    %18 = arith.addf %16, %17 : vector<2x128xf32>
    %19 = math.cos %18 : vector<2x128xf32>
    %c0_4 = arith.constant 0 : index
    %c0_5 = arith.constant 0 : index
    %20 = vector.load %arg1[%c0_4, %c0_5] : memref<2x128xf32, #tpu.memory_space<vmem>>, vector<2x128xf32>
    tpu.vector_store %arg1[%c0_4, %c0_5], %19 {strides = array<i32>} : memref<2x128xf32, #tpu.memory_space<vmem>>, vector<2x128xf32>,
    return
  }
}

</mosaic_0001>

<bundles_post_ra>
// kernel: sinusoidal_position_embeddings.1
= control target key start
LH: loop header
LB: loop body
LE: loop exit
PB: predicated region body
PF: predicated region fallthrough
CT: control target
= control target key end

     0   :  { %v194_v1 = vmov 0   ;;  %s249_s0 = inlined_call_operand.vmem [shape: f32[2,1], index: 0, kind: input, shape index: {}]   ;;  %s250_s1 = inlined_call_operand.hbm [shape: f32[2,128], index: 1, kind: output, shape index: {}]  }
   0x1   :  { %v19_v0 = vld [vmem:[%s249_s0] sm:$0x3]  ;;  %163 = vset.pattern.permute.xlu0 %v194_v1 }
   0x2   :  { %22 = vperm.xlu0 %163, %v19_v0  }
   0x3   :  { %6 = vsyncpa [#allocation3], 0  ;;  %v9_v2 = vlaneseq  ;;  %v195_v11 = vmov 0.0   ;;  %v196_v26 = vmov 2102212464   ;;  %s202_s0 = smov [#allocation2]  }
   0x4   :  { %v197_v28 = vmov 920167782   ;;  %v198_v32 = vmov 1326507024   ;;  %v199_v34 = vmov 683565275  }
   0x5   :  { %v10_v3 = vand.u32 127, %v9_v2  ;;  %v200_v36 = vmov 2475754826   ;;  %v201_v39 = vmov 2131351028   ;;  %s137_s8 = sshll.u32 %s202_s0, 4  ;;  %s138_s8 = int_to_ptr.vmem [resolvable:$true] %s137_s8 }
   0x6   :  { %s170_s9 = scalar_lea.vmem %s138_s8, 32  ;;  %p175_p1 = scmp.lt.s32.totalorder %s138_s8, %s138_s8 }
   0x7   :  { %v145_v4 = vadd.s32 4294967280, %v10_v3  ;;  %vm11_vm0 = vcmp.lt.s32.totalorder %v10_v3, 16  ;;  %p171_p0 = scmp.ne.s32.totalorder %s138_s8, %s170_s9  ;;  %p176_p2 = scmp.lt.s32.totalorder %s170_s9, %s170_s9 }
   0x8   :  { %v18_v12 = vsel %vm11_vm0, -1.5707964, %v195_v11 }
   0x9   :  { %v13_v5 = vsel %vm11_vm0, %v10_v3, %v145_v4  ;;  %p177_p3 = por %p176_p2, %p175_p1 }
   0xa   :  { %v14_v6 = vcvt.s32.f32 %v13_v5 }
   0xb   :  { %p178_p4 = pnand %p177_p3, %p171_p0 }
   0xc   :  { %v15_v7 = vmul.f32 -0.61198276, %v14_v6 }
   0xe   :  { %v16_v8 = vmul.f32 1.442695, %v15_v7 }
  0x10   :  { %164 = vpow2.f32 %v16_v8 }
  0x1a   :  { %v165_v9 = vpop.eup %164 }
  0x81   :  { %v23_v10 = vpop.permute.xlu0 %22 }
  0x82   :  { %v25_v13 = vmul.f32 %v165_v9, %v23_v10 }
  0x84   :  { %v216_v14 = vadd.f32 %v25_v13, %v18_v12 }
  0x86   :  { %v30_v15 = vand.u32 2139095040, %v216_v14  ;;  %v27_v16 = vand.u32 2147483647, %v216_v14  ;;  %vm29_vm8 = vcmp.lt.s32.totalorder %v216_v14, 0  ;;  %vm119_vm13 = vweird.f32 %v216_v14 }
  0x88   :  { %v31_v17 = vshrl.u32 %v30_v15, 23  ;;  %v34_v19 = vand.u32 8388607, %v27_v16  ;;  %vm28_vm9 = vcmp.le.f32.partialorder %v27_v16, 0.7853982 }
  0x8a   :  { %v146_v18 = vadd.s32 4294967169, %v31_v17  ;;  %v35_v22 = vor.u32 8388608, %v34_v19 }
  0x8c   :  { %v37_v20 = vadd.s32 1, %v146_v18  ;;  %v75_v30 = vshll.u32 %v35_v22, 8 }
  0x8e   :  { %vm38_vm1 = vcmp.gt.s32.totalorder %v37_v20, 0 }
  0x8f   :  { %v39_v21 = vsel %vm38_vm1, %v37_v20, 0 }
  0x90   :  { %v41_v23 = vand.u32 31, %v39_v21  ;;  %v40_v24 = vshrl.u32 %v39_v21, 5 }
  0x92   :  { %v42_v25 = vsub.s32 32, %v41_v23  ;;  %v53_v27 = vshll.u32 %v196_v26, %v41_v23  ;;  %v56_v29 = vshll.u32 %v197_v28, %v41_v23  ;;  %v44_v35 = vshll.u32 %v199_v34, %v41_v23 }
  0x93   :  { %v47_v38 = vshll.u32 %v200_v36, %v41_v23  ;;  %v50_v41 = vshll.u32 %v201_v39, %v41_v23  ;;  %vm62_vm2 = vcmp.lt.s32.totalorder %v40_v24, 4  ;;  %vm59_vm3 = vcmp.lt.s32.totalorder %v40_v24, 1 }
  0x94   :  { %v54_v31 = vshrl.u32 %v197_v28, %v42_v25  ;;  %v57_v33 = vshrl.u32 %v198_v32, %v42_v25  ;;  %v45_v37 = vshrl.u32 %v200_v36, %v42_v25  ;;  %v48_v40 = vshrl.u32 %v201_v39, %v42_v25 }
  0x95   :  { %v51_v42 = vshrl.u32 %v196_v26, %v42_v25  ;;  %v43_v46 = vshrl.u32 %v199_v34, %v42_v25  ;;  %vm60_vm4 = vcmp.lt.s32.totalorder %v40_v24, 2  ;;  %vm61_vm5 = vcmp.lt.s32.totalorder %v40_v24, 3 }
  0x96   :  { %v55_v43 = vor.u32 %v54_v31, %v53_v27  ;;  %v58_v44 = vor.u32 %v57_v33, %v56_v29  ;;  %v46_v45 = vor.u32 %v45_v37, %v44_v35  ;;  %v49_v47 = vor.u32 %v48_v40, %v47_v38 }
  0x97   :  { %v52_v48 = vor.u32 %v51_v42, %v50_v41 }
  0x98   :  { %v68_v49 = vsel %vm62_vm2, %v55_v43, 920167782  ;;  %v72_v50 = vsel %vm62_vm2, %v58_v44, 1326507024  ;;  %v67_v52 = vsel %vm59_vm3, %v46_v45, %v49_v47  ;;  %v63_v55 = vsel %vm59_vm3, %v43_v46, %v46_v45 }
  0x99   :  { %v64_v51 = vsel %vm62_vm2, %v52_v48, 2102212464  ;;  %v69_v53 = vsel %vm61_vm5, %v52_v48, %v68_v49  ;;  %v71_v54 = vsel %vm59_vm3, %v49_v47, %v52_v48  ;;  %v73_v58 = vsel %vm61_vm5, %v55_v43, %v72_v50 }
  0x9a   :  { %v65_v56 = vsel %vm61_vm5, %v49_v47, %v64_v51  ;;  %v70_v57 = vsel %vm60_vm4, %v67_v52, %v69_v53  ;;  %v74_v59 = vsel %vm60_vm4, %v71_v54, %v73_v58 }
  0x9b   :  { %v222_v60 = vmul.u32.u64.low %v75_v30, %v70_v57  ;;  %v223_v61 = vmul.u32.u64.high %v75_v30, %v70_v57, %v222_v60  ;;  %v225_v62 = vmul.u32.u64.low %v75_v30, %v74_v59  ;;  %v226_v63 = vmul.u32.u64.high %v75_v30, %v74_v59, %v225_v62 }
  0x9c   :  { %v66_v0 = vsel %vm60_vm4, %v63_v55, %v65_v56 }
  0x9d   :  { %v85_v1 = vadd.s32 1, %v223_v61  ;;  %v82_v2 = vmul.u32 %v75_v30, %v66_v0  ;;  %vm84_vm6 = vc.u32 %v226_v63, %v222_v60  ;;  %v83_v15 = vadd.s32 %v222_v60, %v226_v63 }
  0x9f   :  { %v86_v3 = vsel %vm84_vm6, %v85_v1, %v223_v61 }
  0xa0   :  { %v87_v4 = vadd.s32 %v86_v3, %v82_v2 }
  0xa2   :  { %v88_v5 = vadd.s32 536870912, %v87_v4 }
  0xa4   :  { %v89_v6 = vshrl.u32 %v88_v5, 30 }
  0xa6   :  { %v90_v7 = vshll.u32 %v89_v6, 30  ;;  %v113_v30 = vsub.s32 4, %v89_v6 }
  0xa8   :  { %v91_v8 = vsub.s32 %v87_v4, %v90_v7  ;;  %v114_v32 = vsel %vm29_vm8, %v113_v30, %v89_v6 }
  0xa9   :  { %v116_v33 = vsel %vm28_vm9, 0, %v114_v32 }
  0xaa   :  { %v93_v9 = vsub.s32 0, %v91_v8  ;;  %v120_v34 = vand.u32 3, %v116_v33 }
  0xac   :  { %v147_v10 = vmin.u32 %v93_v9, %v91_v8  ;;  %vm125_vm10 = vcmp.eq.s32.totalorder %v120_v34, 2  ;;  %vm122_vm11 = vcmp.eq.s32.totalorder %v120_v34, 0  ;;  %vm121_vm12 = vcmp.lt.s32.totalorder %v120_v34, 2 }
  0xae   :  { %v95_v11 = vclz %v147_v10 }
  0xb0   :  { %v148_v12 = vadd.s32 4294967294, %v95_v11 }
  0xb2   :  { %vm149_vm7 = vcmp.lt.s32.totalorder %v148_v12, 0 }
  0xb3   :  { %v98_v13 = vsel %vm149_vm7, 0, %v148_v12 }
  0xb4   :  { %v99_v17 = vsub.s32 32, %v98_v13  ;;  %v103_v18 = vsub.s32 4294967266, %v98_v13  ;;  %v100_v19 = vshll.u32 %v91_v8, %v98_v13 }
  0xb6   :  { %v101_v20 = vshrl.u32 %v83_v15, %v99_v17  ;;  %v104_v21 = vadd.s32 127, %v103_v18 }
  0xb8   :  { %v102_v22 = vor.u32 %v101_v20, %v100_v19  ;;  %v105_v23 = vshll.u32 %v104_v21, 23 }
  0xba   :  { %v106_v24 = vor.u32 4788187, %v105_v23  ;;  %v109_v26 = vcvt.s32.f32 %v102_v22 }
  0xbc   :  { %v107_v25 = vand.u32 2147483647, %v106_v24 }
  0xbe   :  { %v110_v27 = vmul.f32 %v109_v26, %v107_v25 }
  0xc0   :  { %v111_v28 = vxor.u32 2147483648, %v110_v27 }
  0xc2   :  { %v112_v29 = vsel %vm29_vm8, %v111_v28, %v110_v27 }
  0xc3   :  { %v115_v31 = vsel %vm28_vm9, %v216_v14, %v112_v29 }
  0xc4   :  { %166 = vcosq.f32 %v115_v31 }
  0xc5   :  { %168 = vsinq.f32 %v115_v31 }
  0xce   :  { %v167_v35 = vpop.eup %166 }
  0xcf   :  { %v169_v36 = vpop.eup %168  ;;  %v126_v37 = vxor.u32 2147483648, %v167_v35 }
  0xd0   :  { %v123_v38 = vxor.u32 2147483648, %v169_v36 }
  0xd1   :  { %v127_v39 = vsel %vm125_vm10, %v126_v37, %v169_v36 }
  0xd2   :  { %v124_v16 = vsel %vm122_vm11, %v167_v35, %v123_v38 }
  0xd3   :  { %v128_v40 = vsel %vm121_vm12, %v124_v16, %v127_v39 }
  0xd4   :  { %v129_v41 = vsel %vm119_vm13, nan, %v128_v40 }
  0xd5   :  { %130 = vst [vmem:[#allocation2] sm:$0x3] %v129_v41 }
  0xd6   :  { %181 = shalt.err (!%p178_p4)
}
  0xd7   :  { %s182_s12 = scalar_lea.hbm %s250_s1, 32 }
  0xd8   :  { %p183_p5 = scmp.ne.s32.totalorder %s250_s1, %s182_s12  ;;  %p186_p6 = scmp.lt.u32.totalorder %s182_s12, %s250_s1 }
  0xda   :  { %p188_p7 = pnand %p186_p6, %p183_p5 }
  0xdc   :  { %191 = shalt.err (!%p188_p7)
}
  0xdd   :  { %140 = dma.vmem_to_hbm [thread:$0]  %s138_s8, 32, %s250_s1, [#allocation3]  }
  0xde   :  { %192 = dma.done.wait [#allocation3], 32  }
  0xdf   :  { %193 = vsyncadd [#allocation3], 4294967264 }
  0xe0   :  { %144 = vsyncpa [#allocation3], 1 }

</bundles_post_ra>
